<compile_context>
chip_gen: v5e
topology: v5e:2x2
jax: 0.10.0
libtpu: 0.0.40
codegen_flags: <defaults>
</compile_context>

<pallas_src>
import functools

import jax
import jax.numpy as jnp
from jax import lax
from jax.experimental import pallas as pl
from jax.experimental.pallas import tpu as pltpu

H1, H2, H3 = 350, 250, 150
LANE = 128
SUBLANE = 8


def _round_up(n, m):
    return ((n + m - 1) // m) * m


def _pad2(x, rows, cols):
    return jnp.pad(x, ((0, rows - x.shape[0]), (0, cols - x.shape[1])))


def _dactor_kernel(state_ref,
                   w1_ref, b1_ref,
                   w2_ref, b2_ref,
                   w3_ref, b3_ref,
                   w4_ref, b4_ref,
                   out_ref, *, action_dim):
    def dense(x, w_ref, b_ref):
        # bf16 x bf16 on the MXU with f32 accumulation; bias/activations stay f32.
        return jnp.dot(x.astype(jnp.bfloat16), w_ref[...],
                       preferred_element_type=jnp.float32) + b_ref[...]

    x = state_ref[...]
    h = jnp.maximum(dense(x, w1_ref, b1_ref), 0.0)   # layer_1 + ReLU (dropout_1 = id)
    h = jnp.maximum(dense(h, w2_ref, b2_ref), 0.0)   # layer_2 + ReLU (dropout_2 = id)
    h = jnp.maximum(dense(h, w3_ref, b3_ref), 0.0)   # layer_3 + ReLU (dropout_3 = id)
    y = dense(h, w4_ref, b4_ref)                     # layer_4 (padded cols are exactly 0)

    # PositiveSoftmaxTanh on the real `action_dim` columns:
    #   cols 0..A-2 -> tanh; col A-1 -> sigmoid;
    #   positive tanh entries are normalized by the sum of positive tanh entries.
    col = lax.broadcasted_iota(jnp.int32, y.shape, dimension=1)
    is_last = col == (action_dim - 1)

    t = jnp.tanh(y)                       # padded cols: tanh(0) = 0 -> excluded below
    s = 0.5 * (jnp.tanh(0.5 * y) + 1.0)   # sigmoid via a single EUP tanh
    v = jnp.where(is_last, s, t)

    pos = jnp.logical_and(t > 0.0, col < (action_dim - 1))
    pos_sum = jnp.sum(jnp.where(pos, t, 0.0), axis=-1, keepdims=True)
    safe_sum = jnp.where(pos_sum > 0.0, pos_sum, 1.0)  # guard rows with no positives
    inv = pl.reciprocal(safe_sum, approx=False)
    out_ref[...] = jnp.where(pos, t * inv, v)


def init_params(key, state_dim, action_dim):
    """f32 parameters with PyTorch-equivalent shapes, stored as (in, out) / (1, out)."""
    dims = [(state_dim, H1), (H1, H2), (H2, H3), (H3, action_dim)]
    params = {}
    for i, (din, dout) in enumerate(dims, start=1):
        key, kw, kb = jax.random.split(key, 3)
        bound = 1.0 / float(din) ** 0.5   # nn.Linear default init range
        params[f"w{i}"] = jax.random.uniform(kw, (din, dout), jnp.float32, -bound, bound)
        params[f"b{i}"] = jax.random.uniform(kb, (1, dout), jnp.float32, -bound, bound)
    return params


def pack_params(params, state_dim, action_dim):
    """Zero-pad every feature dim to a multiple of 128 and store weights as bf16."""
    sp = _round_up(state_dim, LANE)
    h1p, h2p, h3p = (_round_up(h, LANE) for h in (H1, H2, H3))
    ap = _round_up(action_dim, LANE)
    in_dims = (sp, h1p, h2p, h3p)
    out_dims = (h1p, h2p, h3p, ap)
    packed = {}
    for i, (di, do) in enumerate(zip(in_dims, out_dims), start=1):
        packed[f"w{i}"] = _pad2(params[f"w{i}"], di, do).astype(jnp.bfloat16)
        packed[f"b{i}"] = _pad2(params[f"b{i}"], 1, do)       # biases stay f32
    return packed


def dactor_dropout_forward(state, packed, *, action_dim, block_b=128):
    """state: (B, state_dim) f32; packed: output of pack_params. Returns (B, action_dim)."""
    B, state_dim = state.shape
    sp = packed["w1"].shape[0]
    ap = packed["w4"].shape[1]

    tb = block_b if B >= block_b else _round_up(max(B, SUBLANE), SUBLANE)
    bp = _round_up(B, tb)
    state_p = _pad2(state, bp, sp)

    const_map = lambda i: (0, 0)   # weights/biases: same block every grid step -> VMEM-resident
    w_spec = lambda arr: pl.BlockSpec(arr.shape, const_map)

    out = pl.pallas_call(
        functools.partial(_dactor_kernel, action_dim=action_dim),
        out_shape=jax.ShapeDtypeStruct((bp, ap), jnp.float32),
        grid=(bp // tb,),
        in_specs=[
            pl.BlockSpec((tb, sp), lambda i: (i, 0)),
            w_spec(packed["w1"]), w_spec(packed["b1"]),
            w_spec(packed["w2"]), w_spec(packed["b2"]),
            w_spec(packed["w3"]), w_spec(packed["b3"]),
            w_spec(packed["w4"]), w_spec(packed["b4"]),
        ],
        out_specs=pl.BlockSpec((tb, ap), lambda i: (i, 0)),
        compiler_params=pltpu.CompilerParams(dimension_semantics=("parallel",)),
    )(state_p,
      packed["w1"], packed["b1"],
      packed["w2"], packed["b2"],
      packed["w3"], packed["b3"],
      packed["w4"], packed["b4"])
    return out[:B, :action_dim]


def _reference_forward(state, params, action_dim):
    """Pure-JAX reference mirroring the kernel's bf16-weight / f32-accumulation math."""
    def dense(x, w, b):
        return jnp.dot(x.astype(jnp.bfloat16), w.astype(jnp.bfloat16),
                       preferred_element_type=jnp.float32) + b

    h = jnp.maximum(dense(state, params["w1"], params["b1"]), 0.0)
    h = jnp.maximum(dense(h, params["w2"], params["b2"]), 0.0)
    h = jnp.maximum(dense(h, params["w3"], params["b3"]), 0.0)
    y = dense(h, params["w4"], params["b4"])

    t = jnp.tanh(y[:, :-1])
    s = jax.nn.sigmoid(y[:, -1:])
    pos = t > 0.0
    pos_sum = jnp.sum(jnp.where(pos, t, 0.0), axis=-1, keepdims=True)
    safe = jnp.where(pos_sum > 0.0, pos_sum, 1.0)
    t = jnp.where(pos, t / safe, t)
    return jnp.concatenate([t, s], axis=-1)


if __name__ == "__main__":
    state_dim, action_dim = 32, 6

    key = jax.random.PRNGKey(0)
    key, kparams, ks1, ks2 = jax.random.split(key, 4)
    params = init_params(kparams, state_dim, action_dim)
    packed = pack_params(params, state_dim, action_dim)

    # Small batch (single grid step).
    state = jax.random.normal(ks1, (8, state_dim), jnp.float32)
    out = jax.block_until_ready(dactor_dropout_forward(state, packed, action_dim=action_dim))
    ref = _reference_forward(state, params, action_dim)
    assert out.shape == (8, action_dim)
    assert jnp.allclose(out, ref, atol=5e-3, rtol=5e-3), "mismatch vs reference (small batch)"

    # Larger batch exercising the batch grid (300 -> padded 384 = 3 tiles of 128);
    # weights load once and stay VMEM-resident across the 3 grid steps.
    state2 = jax.random.normal(ks2, (300, state_dim), jnp.float32)
    out2 = jax.block_until_ready(dactor_dropout_forward(state2, packed, action_dim=action_dim))
    ref2 = _reference_forward(state2, params, action_dim)
    assert out2.shape == (300, action_dim)
    assert jnp.allclose(out2, ref2, atol=5e-3, rtol=5e-3), "mismatch vs reference (batched grid)"

    print("KERNEL_OK")
</pallas_src>

<mosaic_0001>
module attributes {stable_mosaic.version = 11 : i64} {
  func.func @_dactor_kernel(%arg0: i32, %arg1: memref<8x128xf32, #tpu.memory_space<vmem>>, %arg2: memref<128x384xbf16, #tpu.memory_space<vmem>>, %arg3: memref<1x384xf32, #tpu.memory_space<vmem>>, %arg4: memref<384x256xbf16, #tpu.memory_space<vmem>>, %arg5: memref<1x256xf32, #tpu.memory_space<vmem>>, %arg6: memref<256x256xbf16, #tpu.memory_space<vmem>>, %arg7: memref<1x256xf32, #tpu.memory_space<vmem>>, %arg8: memref<256x128xbf16, #tpu.memory_space<vmem>>, %arg9: memref<1x128xf32, #tpu.memory_space<vmem>>, %arg10: memref<8x128xf32, #tpu.memory_space<vmem>>) attributes {dimension_semantics = [#tpu.dimension_semantics<parallel>], iteration_bounds = array<i64: 1>, scalar_prefetch = 0 : i64, scratch_operands = 0 : i64, tpu.core_type = #tpu.core_type<tc>, window_params = [{transform_indices = @transform_0, window_bounds = array<i64: 8, 128>}, {pipeline_mode = #tpu.pipeline_mode<synchronous>, transform_indices = @transform_1, window_bounds = array<i64: 128, 384>}, {pipeline_mode = #tpu.pipeline_mode<synchronous>, transform_indices = @transform_2, window_bounds = array<i64: 1, 384>}, {pipeline_mode = #tpu.pipeline_mode<synchronous>, transform_indices = @transform_3, window_bounds = array<i64: 384, 256>}, {pipeline_mode = #tpu.pipeline_mode<synchronous>, transform_indices = @transform_4, window_bounds = array<i64: 1, 256>}, {pipeline_mode = #tpu.pipeline_mode<synchronous>, transform_indices = @transform_5, window_bounds = array<i64: 256, 256>}, {pipeline_mode = #tpu.pipeline_mode<synchronous>, transform_indices = @transform_6, window_bounds = array<i64: 1, 256>}, {pipeline_mode = #tpu.pipeline_mode<synchronous>, transform_indices = @transform_7, window_bounds = array<i64: 256, 128>}, {pipeline_mode = #tpu.pipeline_mode<synchronous>, transform_indices = @transform_8, window_bounds = array<i64: 1, 128>}, {transform_indices = @transform_9, window_bounds = array<i64: 8, 128>}]} {
    %c0 = arith.constant 0 : index
    %c0_0 = arith.constant 0 : index
    %0 = vector.load %arg1[%c0, %c0_0] : memref<8x128xf32, #tpu.memory_space<vmem>>, vector<8x128xf32>
    %1 = arith.truncf %0 : vector<8x128xf32> to vector<8x128xbf16>
    %c0_1 = arith.constant 0 : index
    %c0_2 = arith.constant 0 : index
    %2 = vector.load %arg2[%c0_1, %c0_2] : memref<128x384xbf16, #tpu.memory_space<vmem>>, vector<128x384xbf16>
    %cst = arith.constant dense<0.000000e+00> : vector<8x384xf32>
    %3 = tpu.matmul %1, %2, %cst {dimension_numbers = #tpu.dot_dimension_numbers<[1], [0], [0], [1], [0, 0, 1, 1], [], []>} : vector<8x128xbf16>, vector<128x384xbf16>, vector<8x384xf32> -> vector<8x384xf32>
    %c0_3 = arith.constant 0 : index
    %c0_4 = arith.constant 0 : index
    %4 = vector.load %arg3[%c0_3, %c0_4] : memref<1x384xf32, #tpu.memory_space<vmem>>, vector<1x384xf32>
    %5 = vector.broadcast %4 : vector<1x384xf32> to vector<8x384xf32>
    %6 = arith.addf %3, %5 : vector<8x384xf32>
    %cst_5 = arith.constant 0.000000e+00 : f32
    %7 = vector.broadcast %cst_5 : f32 to vector<8x384xf32>
    %8 = arith.maximumf %6, %7 : vector<8x384xf32>
    %9 = arith.truncf %8 : vector<8x384xf32> to vector<8x384xbf16>
    %c0_6 = arith.constant 0 : index
    %c0_7 = arith.constant 0 : index
    %10 = vector.load %arg4[%c0_6, %c0_7] : memref<384x256xbf16, #tpu.memory_space<vmem>>, vector<384x256xbf16>
    %cst_8 = arith.constant dense<0.000000e+00> : vector<8x256xf32>
    %11 = tpu.matmul %9, %10, %cst_8 {dimension_numbers = #tpu.dot_dimension_numbers<[1], [0], [0], [1], [0, 0, 1, 1], [], []>} : vector<8x384xbf16>, vector<384x256xbf16>, vector<8x256xf32> -> vector<8x256xf32>
    %c0_9 = arith.constant 0 : index
    %c0_10 = arith.constant 0 : index
    %12 = vector.load %arg5[%c0_9, %c0_10] : memref<1x256xf32, #tpu.memory_space<vmem>>, vector<1x256xf32>
    %13 = vector.broadcast %12 : vector<1x256xf32> to vector<8x256xf32>
    %14 = arith.addf %11, %13 : vector<8x256xf32>
    %cst_11 = arith.constant 0.000000e+00 : f32
    %15 = vector.broadcast %cst_11 : f32 to vector<8x256xf32>
    %16 = arith.maximumf %14, %15 : vector<8x256xf32>
    %17 = arith.truncf %16 : vector<8x256xf32> to vector<8x256xbf16>
    %c0_12 = arith.constant 0 : index
    %c0_13 = arith.constant 0 : index
    %18 = vector.load %arg6[%c0_12, %c0_13] : memref<256x256xbf16, #tpu.memory_space<vmem>>, vector<256x256xbf16>
    %cst_14 = arith.constant dense<0.000000e+00> : vector<8x256xf32>
    %19 = tpu.matmul %17, %18, %cst_14 {dimension_numbers = #tpu.dot_dimension_numbers<[1], [0], [0], [1], [0, 0, 1, 1], [], []>} : vector<8x256xbf16>, vector<256x256xbf16>, vector<8x256xf32> -> vector<8x256xf32>
    %c0_15 = arith.constant 0 : index
    %c0_16 = arith.constant 0 : index
    %20 = vector.load %arg7[%c0_15, %c0_16] : memref<1x256xf32, #tpu.memory_space<vmem>>, vector<1x256xf32>
    %21 = vector.broadcast %20 : vector<1x256xf32> to vector<8x256xf32>
    %22 = arith.addf %19, %21 : vector<8x256xf32>
    %cst_17 = arith.constant 0.000000e+00 : f32
    %23 = vector.broadcast %cst_17 : f32 to vector<8x256xf32>
    %24 = arith.maximumf %22, %23 : vector<8x256xf32>
    %25 = arith.truncf %24 : vector<8x256xf32> to vector<8x256xbf16>
    %c0_18 = arith.constant 0 : index
    %c0_19 = arith.constant 0 : index
    %26 = vector.load %arg8[%c0_18, %c0_19] : memref<256x128xbf16, #tpu.memory_space<vmem>>, vector<256x128xbf16>
    %cst_20 = arith.constant dense<0.000000e+00> : vector<8x128xf32>
    %27 = tpu.matmul %25, %26, %cst_20 {dimension_numbers = #tpu.dot_dimension_numbers<[1], [0], [0], [1], [0, 0, 1, 1], [], []>} : vector<8x256xbf16>, vector<256x128xbf16>, vector<8x128xf32> -> vector<8x128xf32>
    %c0_21 = arith.constant 0 : index
    %c0_22 = arith.constant 0 : index
    %28 = vector.load %arg9[%c0_21, %c0_22] : memref<1x128xf32, #tpu.memory_space<vmem>>, vector<1x128xf32>
    %29 = vector.broadcast %28 : vector<1x128xf32> to vector<8x128xf32>
    %30 = arith.addf %27, %29 : vector<8x128xf32>
    %31 = tpu.iota {dimensions = array<i32: 1>} : vector<8x128xi32>
    %c5_i32 = arith.constant 5 : i32
    %32 = vector.broadcast %c5_i32 : i32 to vector<8x128xi32>
    %33 = arith.cmpi eq, %31, %32 : vector<8x128xi32>
    %34 = math.tanh %30 : vector<8x128xf32>
    %cst_23 = arith.constant 5.000000e-01 : f32
    %35 = vector.broadcast %cst_23 : f32 to vector<8x128xf32>
    %36 = arith.mulf %35, %30 : vector<8x128xf32>
    %37 = math.tanh %36 : vector<8x128xf32>
    %cst_24 = arith.constant 1.000000e+00 : f32
    %38 = vector.broadcast %cst_24 : f32 to vector<8x128xf32>
    %39 = arith.addf %37, %38 : vector<8x128xf32>
    %cst_25 = arith.constant 5.000000e-01 : f32
    %40 = vector.broadcast %cst_25 : f32 to vector<8x128xf32>
    %41 = arith.mulf %40, %39 : vector<8x128xf32>
    %42 = arith.select %33, %41, %34 : vector<8x128xi1>, vector<8x128xf32>
    %cst_26 = arith.constant 0.000000e+00 : f32
    %43 = vector.broadcast %cst_26 : f32 to vector<8x128xf32>
    %44 = arith.cmpf ogt, %34, %43 : vector<8x128xf32>
    %c5_i32_27 = arith.constant 5 : i32
    %45 = vector.broadcast %c5_i32_27 : i32 to vector<8x128xi32>
    %46 = arith.cmpi slt, %31, %45 : vector<8x128xi32>
    %47 = arith.andi %44, %46 : vector<8x128xi1>
    %cst_28 = arith.constant 0.000000e+00 : f32
    %48 = vector.broadcast %cst_28 : f32 to vector<8x128xf32>
    %49 = arith.select %47, %34, %48 : vector<8x128xi1>, vector<8x128xf32>
    %cst_29 = arith.constant dense<0.000000e+00> : vector<8xf32>
    %50 = vector.multi_reduction <add>, %49, %cst_29 [1] : vector<8x128xf32> to vector<8xf32>
    %51 = vector.shape_cast %50 : vector<8xf32> to vector<8x1xf32>
    %cst_30 = arith.constant 0.000000e+00 : f32
    %52 = vector.broadcast %cst_30 : f32 to vector<8x1xf32>
    %53 = arith.cmpf ogt, %51, %52 : vector<8x1xf32>
    %cst_31 = arith.constant 1.000000e+00 : f32
    %54 = vector.broadcast %cst_31 : f32 to vector<8x1xf32>
    %55 = arith.select %53, %51, %54 : vector<8x1xi1>, vector<8x1xf32>
    %56 = tpu.reciprocal %55 : vector<8x1xf32> -> vector<8x1xf32>
    %57 = vector.broadcast %56 : vector<8x1xf32> to vector<8x128xf32>
    %58 = arith.mulf %34, %57 : vector<8x128xf32>
    %59 = arith.select %47, %58, %42 : vector<8x128xi1>, vector<8x128xf32>
    %c0_32 = arith.constant 0 : index
    %c0_33 = arith.constant 0 : index
    %60 = vector.load %arg10[%c0_32, %c0_33] : memref<8x128xf32, #tpu.memory_space<vmem>>, vector<8x128xf32>
    tpu.vector_store %arg10[%c0_32, %c0_33], %59 {strides = array<i32>} : memref<8x128xf32, #tpu.memory_space<vmem>>, vector<8x128xf32>,
    return
  }
  func.func @transform_0(%arg0: i32) -> (i32, i32) {
    %c0_i32 = arith.constant 0 : i32
    %c0_i32_0 = arith.constant 0 : i32
    return %arg0, %c0_i32 : i32, i32
  }
  func.func @transform_1(%arg0: i32) -> (i32, i32) {
    %c0_i32 = arith.constant 0 : i32
    %c0_i32_0 = arith.constant 0 : i32
    %c0_i32_1 = arith.constant 0 : i32
    return %c0_i32, %c0_i32_0 : i32, i32
  }
  func.func @transform_2(%arg0: i32) -> (i32, i32) {
    %c0_i32 = arith.constant 0 : i32
    %c0_i32_0 = arith.constant 0 : i32
    %c0_i32_1 = arith.constant 0 : i32
    return %c0_i32, %c0_i32_0 : i32, i32
  }
  func.func @transform_3(%arg0: i32) -> (i32, i32) {
    %c0_i32 = arith.constant 0 : i32
    %c0_i32_0 = arith.constant 0 : i32
    %c0_i32_1 = arith.constant 0 : i32
    return %c0_i32, %c0_i32_0 : i32, i32
  }
  func.func @transform_4(%arg0: i32) -> (i32, i32) {
    %c0_i32 = arith.constant 0 : i32
    %c0_i32_0 = arith.constant 0 : i32
    %c0_i32_1 = arith.constant 0 : i32
    return %c0_i32, %c0_i32_0 : i32, i32
  }
  func.func @transform_5(%arg0: i32) -> (i32, i32) {
    %c0_i32 = arith.constant 0 : i32
    %c0_i32_0 = arith.constant 0 : i32
    %c0_i32_1 = arith.constant 0 : i32
    return %c0_i32, %c0_i32_0 : i32, i32
  }
  func.func @transform_6(%arg0: i32) -> (i32, i32) {
    %c0_i32 = arith.constant 0 : i32
    %c0_i32_0 = arith.constant 0 : i32
    %c0_i32_1 = arith.constant 0 : i32
    return %c0_i32, %c0_i32_0 : i32, i32
  }
  func.func @transform_7(%arg0: i32) -> (i32, i32) {
    %c0_i32 = arith.constant 0 : i32
    %c0_i32_0 = arith.constant 0 : i32
    %c0_i32_1 = arith.constant 0 : i32
    return %c0_i32, %c0_i32_0 : i32, i32
  }
  func.func @transform_8(%arg0: i32) -> (i32, i32) {
    %c0_i32 = arith.constant 0 : i32
    %c0_i32_0 = arith.constant 0 : i32
    %c0_i32_1 = arith.constant 0 : i32
    return %c0_i32, %c0_i32_0 : i32, i32
  }
  func.func @transform_9(%arg0: i32) -> (i32, i32) {
    %c0_i32 = arith.constant 0 : i32
    %c0_i32_0 = arith.constant 0 : i32
    return %arg0, %c0_i32 : i32, i32
  }
}

</mosaic_0001>

<bundles_post_ra>
// kernel: tpu_custom_call.1
= control target key start
LH: loop header
LB: loop body
LE: loop exit
PB: predicated region body
PF: predicated region fallthrough
CT: control target
= control target key end

     0   :  { %14 = vsyncpa [#allocation3], 0  ;;  %s2079_s0 = inlined_call_operand.hbm [shape: f32[8,128], index: 0, kind: input, shape index: {}]   ;;  %s2080_s1 = inlined_call_operand.hbm [shape: bf16[128,384], index: 1, kind: input, shape index: {}]   ;;  %s2081_s2 = inlined_call_operand.hbm [shape: f32[1,384], index: 2, kind: input, shape index: {}]   ;;  %s2082_s3 = inlined_call_operand.hbm [shape: bf16[384,256], index: 3, kind: input, shape index: {}]   ;;  %s2083_s4 = inlined_call_operand.vmem [shape: f32[1,256], index: 4, kind: input, shape index: {}]   ;;  %s2084_s5 = inlined_call_operand.hbm [shape: bf16[256,256], index: 5, kind: input, shape index: {}]   ;;  %s2085_s6 = inlined_call_operand.vmem [shape: f32[1,256], index: 6, kind: input, shape index: {}]   ;;  %s2086_s7 = inlined_call_operand.hbm [shape: bf16[256,128], index: 7, kind: input, shape index: {}]   ;;  %s2087_s8 = inlined_call_operand.vmem [shape: f32[1,128], index: 8, kind: input, shape index: {}]   ;;  %s2088_s9 = inlined_call_operand.hbm [shape: f32[8,128], index: 9, kind: output, shape index: {}]  }
   0x1   :  { %15 = vsyncpa [#allocation6], 0 }
   0x2   :  { %16 = vsyncpa [#allocation9], 0 }
   0x3   :  { %17 = vsyncpa [#allocation12], 0  ;;  %s34_s11 = sshll.u32 %s2080_s1, 4  ;;  %s35_s11 = int_to_ptr.hbm [resolvable:$true] %s34_s11 }
   0x4   :  { %18 = vsyncpa [#allocation4], 0  ;;  %s1978_s12 = smov [#allocation5]   ;;  %s58_s16 = sshll.u32 %s2082_s3, 4  ;;  %s59_s16 = int_to_ptr.hbm [resolvable:$true] %s58_s16 }
   0x5   :  { %s36_s13 = sshll.u32 %s1978_s12, 4  ;;  %s1979_s17 = smov 192   ;;  %s37_s13 = int_to_ptr.vmem [resolvable:$true] %s36_s13 }
   0x6   :  { %s1980_s18 = smov 12   ;;  %s1981_s19 = smov [#allocation8]  }
   0x7   :  { %42 = dma.hbm_to_vmem [thread:$0]  %s35_s11, 3072, %s37_s13, [#allocation6], %s1979_s17, %s1979_s17, %s1980_s18  }
   0x8   :  { %s60_s20 = sshll.u32 %s1981_s19, 4  ;;  %s1982_s21 = smov 128   ;;  %s61_s20 = int_to_ptr.vmem [resolvable:$true] %s60_s20 }
   0x9   :  { %s1983_s22 = smov 8   ;;  %s24_s24 = sshll.u32 %s2079_s0, 4  ;;  %s25_s24 = int_to_ptr.hbm [resolvable:$true] %s24_s24 }
   0xa   :  { %66 = dma.hbm_to_vmem [thread:$0]  %s59_s16, 6144, %s61_s20, [#allocation9], %s1982_s21, %s1982_s21, %s1983_s22  }
   0xb   :  { %s1984_s25 = smov [#allocation2]   ;;  %s48_s28 = sshll.u32 %s2081_s2, 4  ;;  %s49_s28 = int_to_ptr.hbm [resolvable:$true] %s48_s28 }
   0xc   :  { %s26_s26 = sshll.u32 %s1984_s25, 4  ;;  %s1985_s29 = smov [#allocation7]   ;;  %s27_s26 = int_to_ptr.vmem [resolvable:$true] %s26_s26 }
   0xd   :  { %29 = dma.hbm_to_vmem [thread:$0]  %s25_s24, 128, %s27_s26, [#allocation3]  }
   0xe   :  { %s50_s30 = sshll.u32 %s1985_s29, 4  ;;  %s73_s12 = sshll.u32 %s2084_s5, 4  ;;  %s51_s30 = int_to_ptr.vmem [resolvable:$true] %s50_s30  ;;  %s74_s12 = int_to_ptr.hbm [resolvable:$true] %s73_s12 }
   0xf   :  { %53 = dma.hbm_to_vmem [thread:$0]  %s49_s28, 48, %s51_s30, [#allocation6]  }
  0x10   :  { %s88_s14 = sshll.u32 %s2086_s7, 4  ;;  %s1986_s15 = smov [#allocation10]   ;;  %s89_s14 = int_to_ptr.hbm [resolvable:$true] %s88_s14 }
  0x11   :  { %s75_s16 = sshll.u32 %s1986_s15, 4  ;;  %s1987_s2 = smov [#allocation11]   ;;  %s76_s16 = int_to_ptr.vmem [resolvable:$true] %s75_s16 }
  0x12   :  { %81 = dma.hbm_to_vmem [thread:$0]  %s74_s12, 4096, %s76_s16, [#allocation9], %s1982_s21, %s1982_s21, %s1983_s22  }
  0x13   :  { %s90_s17 = sshll.u32 %s1987_s2, 4  ;;  %s1988_s18 = smov 64   ;;  %s91_s17 = int_to_ptr.vmem [resolvable:$true] %s90_s17 }
  0x14   :  { %s1989_s19 = smov 4  }
  0x15   :  { %96 = dma.hbm_to_vmem [thread:$0]  %s89_s14, 2048, %s91_s17, [#allocation12], %s1988_s18, %s1988_s18, %s1989_s19  }
  0x16   :  { %1968 = dma.done.wait [#allocation3], 128  }
  0x17   :  { %1969 = vsyncadd [#allocation3], 4294967168 }
  0x18   :  { %1970 = dma.done.wait [#allocation6], 3120  }
  0x19   :  { %1971 = vsyncadd [#allocation6], 4294964176 }
  0x1a   :  { %1972 = dma.done.wait [#allocation9], 10240  }
  0x1b   :  { %1973 = vsyncadd [#allocation9], 4294957056 }
  0x1c   :  { %1974 = dma.done.wait [#allocation12], 2048  }
  0x1d   :  { %1975 = vsyncadd [#allocation12], 4294965248  ;;  %v1266_v0 = vld [vmem:[#allocation5 + $0xa8] sm:$0xf]  ;;  %v1682_v1 = vld [vmem:[#allocation5 + $0xb0] sm:$0xf0] }
  0x1e   :  { %v1681_v2 = vld [vmem:[#allocation5 + $0xac] sm:$0xf]  ;;  %v1267_v3 = vor.u32 %v1682_v1, %v1266_v0  ;;  %v1268_v4 = vld [vmem:[#allocation5 + $0xb4] sm:$0xf0]  ;;  %v1254_v5 = vld [vmem:[#allocation5 + $0x90] sm:$0xf] }
  0x1f   :  { %v1679_v6 = vld [vmem:[#allocation5 + $0x98] sm:$0xf0]  ;;  %v1271_v7 = vor.u32 %v1681_v2, %v1268_v4  ;;  %v1678_v8 = vld [vmem:[#allocation5 + $0x94] sm:$0xf]  ;;  %v1256_v9 = vld [vmem:[#allocation5 + $0x9c] sm:$0xf0] }
  0x20   :  { %v1274_v10 = vld [vmem:[#allocation5 + $0xb0] sm:$0xf]  ;;  %293 = vmatpush.bf16.msra.mxu0 %v1267_v3  ;;  %v1255_v11 = vor.u32 %v1679_v6, %v1254_v5  ;;  %v1683_v12 = vld [vmem:[#allocation5 + $0xb8] sm:$0xf0]  ;;  %v1259_v13 = vor.u32 %v1678_v8, %v1256_v9  ;;  %v1242_v15 = vld [vmem:[#allocation5 + $0x78] sm:$0xf] }
  0x21   :  { %306 = vmatpush.bf16.msra.mxu1 %v1271_v7  ;;  %v1275_v14 = vor.u32 %v1683_v12, %v1274_v10  ;;  %v1676_v16 = vld [vmem:[#allocation5 + $0x80] sm:$0xf0]  ;;  %v1262_v17 = vld [vmem:[#allocation5 + $0x98] sm:$0xf]  ;;  %v1675_v18 = vld [vmem:[#allocation5 + $0x7c] sm:$0xf] }
  0x22   :  { %v1244_v19 = vld [vmem:[#allocation5 + $0x84] sm:$0xf0]  ;;  %v1680_v20 = vld [vmem:[#allocation5 + $0xa0] sm:$0xf0]  ;;  %v1243_v22 = vor.u32 %v1676_v16, %v1242_v15  ;;  %v1250_v23 = vld [vmem:[#allocation5 + $0x80] sm:$0xf] }
  0x23   :  { %319 = vmatpush.bf16.msra.mxu2 %v1275_v14  ;;  %v1263_v21 = vor.u32 %v1680_v20, %v1262_v17  ;;  %v1677_v24 = vld [vmem:[#allocation5 + $0x88] sm:$0xf0]  ;;  %v1247_v25 = vor.u32 %v1675_v18, %v1244_v19  ;;  %v1230_v26 = vld [vmem:[#allocation5 + $0x60] sm:$0xf]  ;;  %v1672_v28 = vld [vmem:[#allocation5 + $0x64] sm:$0xf] }
  0x24   :  { %294 = vmatpush.bf16.msra.mxu0 %v1255_v11  ;;  %v1673_v27 = vld [vmem:[#allocation5 + $0x68] sm:$0xf0]  ;;  %v1232_v29 = vld [vmem:[#allocation5 + $0x6c] sm:$0xf0]  ;;  %v1251_v30 = vor.u32 %v1677_v24, %v1250_v23  ;;  %v1238_v32 = vld [vmem:[#allocation5 + $0x68] sm:$0xf] }
  0x25   :  { %307 = vmatpush.bf16.msra.mxu1 %v1259_v13  ;;  %v1231_v31 = vor.u32 %v1673_v27, %v1230_v26  ;;  %v1674_v33 = vld [vmem:[#allocation5 + $0x70] sm:$0xf0]  ;;  %v1235_v34 = vor.u32 %v1672_v28, %v1232_v29  ;;  %v1218_v35 = vld [vmem:[#allocation5 + $0x48] sm:$0xf]  ;;  %v1669_v37 = vld [vmem:[#allocation5 + $0x4c] sm:$0xf] }
  0x26   :  { %v1670_v36 = vld [vmem:[#allocation5 + $0x50] sm:$0xf0]  ;;  %v1220_v38 = vld [vmem:[#allocation5 + $0x54] sm:$0xf0]  ;;  %v1239_v39 = vor.u32 %v1674_v33, %v1238_v32  ;;  %v1206_v41 = vld [vmem:[#allocation5 + $0x30] sm:$0xf] }
  0x27   :  { %320 = vmatpush.bf16.msra.mxu2 %v1263_v21  ;;  %v1219_v40 = vor.u32 %v1670_v36, %v1218_v35  ;;  %v1226_v42 = vld [vmem:[#allocation5 + $0x50] sm:$0xf]  ;;  %v1671_v43 = vld [vmem:[#allocation5 + $0x58] sm:$0xf0]  ;;  %v1223_v44 = vor.u32 %v1669_v37, %v1220_v38  ;;  %v1334_v46 = vld [vmem:[#allocation8 + $0x70] sm:$0xf] }
  0x28   :  { %295 = vmatpush.bf16.msra.mxu0 %v1243_v22  ;;  %v1667_v45 = vld [vmem:[#allocation5 + $0x38] sm:$0xf0]  ;;  %v1666_v48 = vld [vmem:[#allocation5 + $0x34] sm:$0xf]  ;;  %v1208_v49 = vld [vmem:[#allocation5 + $0x3c] sm:$0xf0]  ;;  %v1227_v52 = vor.u32 %v1671_v43, %v1226_v42 }
  0x29   :  { %308 = vmatpush.bf16.msra.mxu1 %v1247_v25  ;;  %v1699_v47 = vld [vmem:[#allocation8 + $0x74] sm:$0xf0]  ;;  %v1326_v51 = vld [vmem:[#allocation8 + $0x60] sm:$0xf]  ;;  %v1697_v53 = vld [vmem:[#allocation8 + $0x64] sm:$0xf0]  ;;  %v1207_v54 = vor.u32 %v1667_v45, %v1206_v41  ;;  %v1211_v59 = vor.u32 %v1666_v48, %v1208_v49 }
  0x2a   :  { %v1335_v50 = vor.u32 %v1699_v47, %v1334_v46  ;;  %v1194_v55 = vld [vmem:[#allocation5 + $0x18] sm:$0xf]  ;;  %v1668_v57 = vld [vmem:[#allocation5 + $0x40] sm:$0xf0]  ;;  %v1327_v58 = vor.u32 %v1697_v53, %v1326_v51  ;;  %v1318_v61 = vld [vmem:[#allocation8 + $0x50] sm:$0xf] }
  0x2b   :  { %321 = vmatpush.bf16.msra.mxu2 %v1251_v30  ;;  %v1214_v56 = vld [vmem:[#allocation5 + $0x38] sm:$0xf]  ;;  %v1664_v60 = vld [vmem:[#allocation5 + $0x20] sm:$0xf0]  ;;  %v1695_v62 = vld [vmem:[#allocation8 + $0x54] sm:$0xf0] }
  0x2c   :  { %296 = vmatpush.bf16.msra.mxu0 %v1231_v31  ;;  %632 = vmatpush.bf16.msra.mxu3 %v1335_v50  ;;  %v1663_v63 = vld [vmem:[#allocation5 + $0x1c] sm:$0xf]  ;;  %v1196_v0 = vld [vmem:[#allocation5 + $0x24] sm:$0xf0]  ;;  %v1215_v1 = vor.u32 %v1668_v57, %v1214_v56  ;;  %v1182_v2 = vld [vmem:[#allocation5] sm:$0xf]  ;;  %v1195_v3 = vor.u32 %v1664_v60, %v1194_v55  ;;  %v1319_v7 = vor.u32 %v1695_v62, %v1318_v61 }
  0x2d   :  { %309 = vmatpush.bf16.msra.mxu1 %v1235_v34  ;;  %v1661_v4 = vld [vmem:[#allocation5 + $0x8] sm:$0xf0]  ;;  %v1202_v5 = vld [vmem:[#allocation5 + $0x20] sm:$0xf]  ;;  %v1199_v8 = vor.u32 %v1663_v63, %v1196_v0  ;;  %v1660_v9 = vld [vmem:[#allocation5 + $0x4] sm:$0xf] }
  0x2e   :  { %v1665_v6 = vld [vmem:[#allocation5 + $0x28] sm:$0xf0]  ;;  %v1310_v10 = vld [vmem:[#allocation8 + $0x40] sm:$0xf]  ;;  %v1184_v12 = vld [vmem:[#allocation5 + $0xc] sm:$0xf0]  ;;  %v1183_v18 = vor.u32 %v1661_v4, %v1182_v2 }
  0x2f   :  { %322 = vmatpush.bf16.msra.mxu2 %v1239_v39  ;;  %v1693_v11 = vld [vmem:[#allocation8 + $0x44] sm:$0xf0]  ;;  %v1398_v13 = vld [vmem:[#allocation8 + $0xf0] sm:$0xf]  ;;  %v1715_v14 = vld [vmem:[#allocation8 + $0xf4] sm:$0xf0]  ;;  %v1203_v15 = vor.u32 %v1665_v6, %v1202_v5  ;;  %v1187_v23 = vor.u32 %v1660_v9, %v1184_v12 }
  0x30   :  { %297 = vmatpush.bf16.msra.mxu0 %v1219_v40  ;;  %633 = vmatpush.bf16.msra.mxu3 %v1327_v58  ;;  %v1462_v16 = vld [vmem:[#allocation8 + $0x170] sm:$0xf]  ;;  %v1731_v17 = vld [vmem:[#allocation8 + $0x174] sm:$0xf0]  ;;  %v1190_v20 = vld [vmem:[#allocation5 + $0x8] sm:$0xf]  ;;  %v1311_v22 = vor.u32 %v1693_v11, %v1310_v10  ;;  %v1399_v24 = vor.u32 %v1715_v14, %v1398_v13 }
  0x31   :  { %310 = vmatpush.bf16.msra.mxu1 %v1223_v44  ;;  %v123_v19 = vld [vmem:[#allocation2] sm:$0xff]  ;;  %v1662_v21 = vld [vmem:[#allocation5 + $0x10] sm:$0xf0]  ;;  %v1390_v25 = vld [vmem:[#allocation8 + $0xe0] sm:$0xf]  ;;  %v1463_v31 = vor.u32 %v1731_v17, %v1462_v16  ;;  %s1167_s24 = sshll.u32 %s2088_s9, 4  ;;  %s1168_s24 = int_to_ptr.hbm [resolvable:$true] %s1167_s24 }
  0x32   :  { %v1698_v26 = vld [vmem:[#allocation8 + $0x74] sm:$0xf]  ;;  %v1336_v27 = vld [vmem:[#allocation8 + $0x78] sm:$0xf0]  ;;  %v1713_v28 = vld [vmem:[#allocation8 + $0xe4] sm:$0xf0]  ;;  %v124_v32 = vpack.c.bf16 %v123_v19, %v123_v19  ;;  %v1191_v33 = vor.u32 %v1662_v21, %v1190_v20 }
  0x33   :  { %323 = vmatpush.bf16.msra.mxu2 %v1227_v52  ;;  %v1302_v29 = vld [vmem:[#allocation8 + $0x30] sm:$0xf]  ;;  %v1691_v30 = vld [vmem:[#allocation8 + $0x34] sm:$0xf0]  ;;  %v1454_v34 = vld [vmem:[#allocation8 + $0x160] sm:$0xf]  ;;  %v1339_v36 = vor.u32 %v1698_v26, %v1336_v27  ;;  %v1391_v37 = vor.u32 %v1713_v28, %v1390_v25 }
  0x34   :  { %298 = vmatpush.bf16.msra.mxu0 %v1207_v54  ;;  %634 = vmatpush.bf16.msra.mxu3 %v1319_v7  ;;  %v1729_v35 = vld [vmem:[#allocation8 + $0x164] sm:$0xf0]  ;;  %v1382_v38 = vld [vmem:[#allocation8 + $0xd0] sm:$0xf]  ;;  %v1303_v39 = vor.u32 %v1691_v30, %v1302_v29  ;;  %v1696_v40 = vld [vmem:[#allocation8 + $0x64] sm:$0xf] }
  0x35   :  { %311 = vmatpush.bf16.msra.mxu1 %v1211_v59  ;;  %v1328_v41 = vld [vmem:[#allocation8 + $0x68] sm:$0xf0]  ;;  %v1711_v42 = vld [vmem:[#allocation8 + $0xd4] sm:$0xf0]  ;;  %v1294_v43 = vld [vmem:[#allocation8 + $0x20] sm:$0xf]  ;;  %v1455_v45 = vor.u32 %v1729_v35, %v1454_v34 }
  0x36   :  { %v1689_v44 = vld [vmem:[#allocation8 + $0x24] sm:$0xf0]  ;;  %v1446_v46 = vld [vmem:[#allocation8 + $0x150] sm:$0xf]  ;;  %v1727_v47 = vld [vmem:[#allocation8 + $0x154] sm:$0xf0]  ;;  %v1331_v49 = vor.u32 %v1696_v40, %v1328_v41  ;;  %v1383_v50 = vor.u32 %v1711_v42, %v1382_v38 }
  0x37   :  { %324 = vmatpush.bf16.msra.mxu2 %v1215_v1  ;;  %v1374_v48 = vld [vmem:[#allocation8 + $0xc0] sm:$0xf]  ;;  %v1295_v51 = vor.u32 %v1689_v44, %v1294_v43  ;;  %v1694_v52 = vld [vmem:[#allocation8 + $0x54] sm:$0xf]  ;;  %v1320_v53 = vld [vmem:[#allocation8 + $0x58] sm:$0xf0]  ;;  %v1447_v57 = vor.u32 %v1727_v47, %v1446_v46 }
  0x38   :  { %299 = vmatpush.bf16.msra.mxu0 %v1195_v3  ;;  %635 = vmatpush.bf16.msra.mxu3 %v1311_v22  ;;  %v1709_v54 = vld [vmem:[#allocation8 + $0xc4] sm:$0xf0]  ;;  %v1286_v55 = vld [vmem:[#allocation8 + $0x10] sm:$0xf]  ;;  %v1687_v56 = vld [vmem:[#allocation8 + $0x14] sm:$0xf0]  ;;  %v1323_v60 = vor.u32 %v1694_v52, %v1320_v53 }
  0x39   :  { %312 = vmatpush.bf16.msra.mxu1 %v1199_v8  ;;  %v1438_v58 = vld [vmem:[#allocation8 + $0x140] sm:$0xf]  ;;  %v1725_v59 = vld [vmem:[#allocation8 + $0x144] sm:$0xf0]  ;;  %v1375_v61 = vor.u32 %v1709_v54, %v1374_v48  ;;  %v1366_v62 = vld [vmem:[#allocation8 + $0xb0] sm:$0xf]  ;;  %v1287_v63 = vor.u32 %v1687_v56, %v1286_v55 }
  0x3a   :  { %v1692_v0 = vld [vmem:[#allocation8 + $0x44] sm:$0xf]  ;;  %v1312_v1 = vld [vmem:[#allocation8 + $0x48] sm:$0xf0]  ;;  %v1707_v2 = vld [vmem:[#allocation8 + $0xb4] sm:$0xf0]  ;;  %v1439_v5 = vor.u32 %v1725_v59, %v1438_v58 }
  0x3b   :  { %325 = vmatpush.bf16.msra.mxu2 %v1203_v15  ;;  %v1278_v3 = vld [vmem:[#allocation8] sm:$0xf]  ;;  %v1685_v4 = vld [vmem:[#allocation8 + $0x4] sm:$0xf0]  ;;  %v1714_v6 = vld [vmem:[#allocation8 + $0xf4] sm:$0xf]  ;;  %v1315_v8 = vor.u32 %v1692_v0, %v1312_v1  ;;  %v1367_v9 = vor.u32 %v1707_v2, %v1366_v62 }
  0x3c   :  { %300 = vmatpush.bf16.msra.mxu0 %v1183_v18  ;;  %636 = vmatpush.bf16.msra.mxu3 %v1303_v39  ;;  %v1400_v7 = vld [vmem:[#allocation8 + $0xf8] sm:$0xf0]  ;;  %v1279_v10 = vor.u32 %v1685_v4, %v1278_v3  ;;  %v1690_v11 = vld [vmem:[#allocation8 + $0x34] sm:$0xf]  ;;  %v1358_v13 = vld [vmem:[#allocation8 + $0xa0] sm:$0xf] }
  0x3d   :  { %313 = vmatpush.bf16.msra.mxu1 %v1187_v23  ;;  %v1304_v12 = vld [vmem:[#allocation8 + $0x38] sm:$0xf0]  ;;  %v1705_v14 = vld [vmem:[#allocation8 + $0xa4] sm:$0xf0]  ;;  %v1403_v15 = vor.u32 %v1714_v6, %v1400_v7  ;;  %v1712_v16 = vld [vmem:[#allocation8 + $0xe4] sm:$0xf] }
  0x3e   :  { %v1392_v17 = vld [vmem:[#allocation8 + $0xe8] sm:$0xf0]  ;;  %v1307_v18 = vor.u32 %v1690_v11, %v1304_v12  ;;  %v1359_v19 = vor.u32 %v1705_v14, %v1358_v13  ;;  %v1688_v20 = vld [vmem:[#allocation8 + $0x24] sm:$0xf]  ;;  %v1350_v22 = vld [vmem:[#allocation8 + $0x90] sm:$0xf] }
  0x3f   :  { %301 = vmatmul.bf16.vlgmr.msra.gmra.mxu0 %v124_v32  ;;  %326 = vmatpush.bf16.msra.mxu2 %v1191_v33  ;;  %v1296_v21 = vld [vmem:[#allocation8 + $0x28] sm:$0xf0]  ;;  %v1703_v23 = vld [vmem:[#allocation8 + $0x94] sm:$0xf0]  ;;  %v1342_v27 = vld [vmem:[#allocation8 + $0x80] sm:$0xf] }
  0x40   :  { %645 = vmatpush.bf16.msrb.mxu0 %v1399_v24  ;;  %314 = vmatmul.bf16.vlgmr.msra.gmra.mxu1 %v124_v32  ;;  %v1395_v24 = vor.u32 %v1712_v16, %v1392_v17  ;;  %v1299_v25 = vor.u32 %v1688_v20, %v1296_v21  ;;  %v1351_v26 = vor.u32 %v1703_v23, %v1350_v22  ;;  %v1701_v28 = vld [vmem:[#allocation8 + $0x84] sm:$0xf0]  ;;  %v1730_v29 = vld [vmem:[#allocation8 + $0x174] sm:$0xf]  ;;  %v1464_v30 = vld [vmem:[#allocation8 + $0x178] sm:$0xf0] }
  0x41   :  { %658 = vmatpush.bf16.msrb.mxu1 %v1463_v31  ;;  %637 = vmatpush.bf16.msra.mxu3 %v1295_v51  ;;  %v1343_v31 = vor.u32 %v1701_v28, %v1342_v27  ;;  %v1728_v33 = vld [vmem:[#allocation8 + $0x164] sm:$0xf]  ;;  %v1456_v34 = vld [vmem:[#allocation8 + $0x168] sm:$0xf0]  ;;  %v1710_v38 = vld [vmem:[#allocation8 + $0xd4] sm:$0xf] }
  0x42   :  { %327 = vmatmul.bf16.vlgmr.msra.gmra.mxu2 %v124_v32  ;;  %v1467_v32 = vor.u32 %v1730_v29, %v1464_v30  ;;  %v1459_v35 = vor.u32 %v1728_v33, %v1456_v34  ;;  %v1384_v40 = vld [vmem:[#allocation8 + $0xd8] sm:$0xf0]  ;;  %v1726_v41 = vld [vmem:[#allocation8 + $0x154] sm:$0xf]  ;;  %v1723_v46 = vld [vmem:[#allocation8 + $0x134] sm:$0xf0] }
  0x43   :  { %671 = vmatpush.bf16.msrb.mxu2 %v1339_v36  ;;  %v1686_v36 = vld [vmem:[#allocation8 + $0x14] sm:$0xf]  ;;  %v1448_v42 = vld [vmem:[#allocation8 + $0x158] sm:$0xf0]  ;;  %v1387_v43 = vor.u32 %v1710_v38, %v1384_v40  ;;  %v1684_v48 = vld [vmem:[#allocation8 + $0x4] sm:$0xf] }
  0x44   :  { %646 = vmatpush.bf16.msrb.mxu0 %v1391_v37  ;;  %v1288_v37 = vld [vmem:[#allocation8 + $0x18] sm:$0xf0]  ;;  %v1451_v44 = vor.u32 %v1726_v41, %v1448_v42  ;;  %v1376_v52 = vld [vmem:[#allocation8 + $0xc8] sm:$0xf0]  ;;  %v1724_v53 = vld [vmem:[#allocation8 + $0x144] sm:$0xf] }
  0x45   :  { %659 = vmatpush.bf16.msrb.mxu1 %v1455_v45  ;;  %638 = vmatpush.bf16.msra.mxu3 %v1287_v63  ;;  %v1291_v39 = vor.u32 %v1686_v36, %v1288_v37  ;;  %v1430_v45 = vld [vmem:[#allocation8 + $0x130] sm:$0xf]  ;;  %v1440_v54 = vld [vmem:[#allocation8 + $0x148] sm:$0xf0]  ;;  %v1721_v58 = vld [vmem:[#allocation8 + $0x124] sm:$0xf0] }
  0x46   :  { %v1431_v47 = vor.u32 %v1723_v46, %v1430_v45  ;;  %v1443_v56 = vor.u32 %v1724_v53, %v1440_v54  ;;  %v1722_v62 = vld [vmem:[#allocation8 + $0x134] sm:$0xf]  ;;  %v1432_v0 = vld [vmem:[#allocation8 + $0x138] sm:$0xf0]  ;;  %v1414_v2 = vld [vmem:[#allocation8 + $0x110] sm:$0xf] }
  0x47   :  { %672 = vmatpush.bf16.msrb.mxu2 %v1331_v49  ;;  %v1280_v49 = vld [vmem:[#allocation8 + $0x8] sm:$0xf0]  ;;  %v1435_v1 = vor.u32 %v1722_v62, %v1432_v0  ;;  %v1719_v3 = vld [vmem:[#allocation8 + $0x114] sm:$0xf0]  ;;  %v1720_v7 = vld [vmem:[#allocation8 + $0x124] sm:$0xf] }
  0x48   :  { %647 = vmatpush.bf16.msrb.mxu0 %v1383_v50  ;;  %v1708_v50 = vld [vmem:[#allocation8 + $0xc4] sm:$0xf]  ;;  %v1283_v51 = vor.u32 %v1684_v48, %v1280_v49  ;;  %v1415_v4 = vor.u32 %v1719_v3, %v1414_v2  ;;  %v1360_v6 = vld [vmem:[#allocation8 + $0xa8] sm:$0xf0]  ;;  %v1406_v11 = vld [vmem:[#allocation8 + $0x100] sm:$0xf] }
  0x49   :  { %660 = vmatpush.bf16.msrb.mxu1 %v1447_v57  ;;  %639 = vmatpush.bf16.msra.mxu3 %v1279_v10  ;;  %v1379_v55 = vor.u32 %v1708_v50, %v1376_v52  ;;  %v1422_v57 = vld [vmem:[#allocation8 + $0x120] sm:$0xf]  ;;  %v1717_v12 = vld [vmem:[#allocation8 + $0x104] sm:$0xf0]  ;;  %v1702_v14 = vld [vmem:[#allocation8 + $0x94] sm:$0xf] }
  0x4a   :  { %v1423_v59 = vor.u32 %v1721_v58, %v1422_v57  ;;  %v1407_v13 = vor.u32 %v1717_v12, %v1406_v11  ;;  %v1718_v16 = vld [vmem:[#allocation8 + $0x114] sm:$0xf]  ;;  %v1700_v20 = vld [vmem:[#allocation8 + $0x84] sm:$0xf]  ;;  %v1344_v21 = vld [vmem:[#allocation8 + $0x88] sm:$0xf0] }
  0x4b   :  { %673 = vmatpush.bf16.msrb.mxu2 %v1323_v60  ;;  %v1706_v60 = vld [vmem:[#allocation8 + $0xb4] sm:$0xf]  ;;  %v1716_v22 = vld [vmem:[#allocation8 + $0x104] sm:$0xf]  ;;  %v1347_v23 = vor.u32 %v1700_v20, %v1344_v21  ;;  %v1747_v27 = vld [vmem:[#allocation10 + $0x74] sm:$0xf0] }
  0x4c   :  { %648 = vmatpush.bf16.msrb.mxu0 %v1375_v61  ;;  %v1368_v61 = vld [vmem:[#allocation8 + $0xb8] sm:$0xf0]  ;;  %v1518_v29 = vld [vmem:[#allocation10 + $0x60] sm:$0xf]  ;;  %v1745_v30 = vld [vmem:[#allocation10 + $0x64] sm:$0xf0] }
  0x4d   :  { %661 = vmatpush.bf16.msrb.mxu1 %v1439_v5  ;;  %684 = vmatpush.bf16.msrb.mxu3 %v1403_v15  ;;  %v1371_v63 = vor.u32 %v1706_v60, %v1368_v61  ;;  %v1704_v5 = vld [vmem:[#allocation8 + $0xa4] sm:$0xf]  ;;  %v1352_v15 = vld [vmem:[#allocation8 + $0x98] sm:$0xf0]  ;;  %v1510_v33 = vld [vmem:[#allocation10 + $0x50] sm:$0xf] }
  0x4e   :  { %v1355_v17 = vor.u32 %v1702_v14, %v1352_v15  ;;  %v1743_v34 = vld [vmem:[#allocation10 + $0x54] sm:$0xf0]  ;;  %v1746_v41 = vld [vmem:[#allocation10 + $0x74] sm:$0xf]  ;;  %v1528_v42 = vld [vmem:[#allocation10 + $0x78] sm:$0xf0] }
  0x4f   :  { %674 = vmatpush.bf16.msrb.mxu2 %v1315_v8  ;;  %v1363_v8 = vor.u32 %v1704_v5, %v1360_v6  ;;  %v1511_v37 = vor.u32 %v1743_v34, %v1510_v33  ;;  %v1741_v45 = vld [vmem:[#allocation10 + $0x44] sm:$0xf0]  ;;  %v1531_v48 = vor.u32 %v1746_v41, %v1528_v42  ;;  %v1744_v50 = vld [vmem:[#allocation10 + $0x64] sm:$0xf]  ;;  %v1512_v60 = vld [vmem:[#allocation10 + $0x58] sm:$0xf0] }
  0x50   :  { %649 = vmatpush.bf16.msrb.mxu0 %v1367_v9  ;;  %v1424_v9 = vld [vmem:[#allocation8 + $0x128] sm:$0xf0]  ;;  %v1740_v0 = vld [vmem:[#allocation10 + $0x44] sm:$0xf]  ;;  %v1590_v5 = vld [vmem:[#allocation10 + $0xf0] sm:$0xf] }
  0x51   :  { %685 = vmatpush.bf16.msrb.mxu3 %v1395_v24  ;;  %662 = vmatpush.bf16.msrb.mxu1 %v1431_v47  ;;  %v1427_v10 = vor.u32 %v1720_v7, %v1424_v9  ;;  %v1408_v24 = vld [vmem:[#allocation8 + $0x108] sm:$0xf0]  ;;  %v1763_v6 = vld [vmem:[#allocation10 + $0xf4] sm:$0xf0]  ;;  %v1762_v7 = vld [vmem:[#allocation10 + $0xf4] sm:$0xf] }
  0x52   :  { %v1592_v9 = vld [vmem:[#allocation10 + $0xf8] sm:$0xf0]  ;;  %v1494_v11 = vld [vmem:[#allocation10 + $0x30] sm:$0xf]  ;;  %v1739_v12 = vld [vmem:[#allocation10 + $0x34] sm:$0xf0] }
  0x53   :  { %675 = vmatpush.bf16.msrb.mxu2 %v1307_v18  ;;  %v1416_v18 = vld [vmem:[#allocation8 + $0x118] sm:$0xf0]  ;;  %v1495_v14 = vor.u32 %v1739_v12, %v1494_v11  ;;  %v1760_v20 = vld [vmem:[#allocation10 + $0xe4] sm:$0xf]  ;;  %v1584_v21 = vld [vmem:[#allocation10 + $0xe8] sm:$0xf0] }
  0x54   :  { %650 = vmatpush.bf16.msrb.mxu0 %v1359_v19  ;;  %v1419_v19 = vor.u32 %v1718_v16, %v1416_v18  ;;  %v1496_v15 = vld [vmem:[#allocation10 + $0x38] sm:$0xf0]  ;;  %v1582_v16 = vld [vmem:[#allocation10 + $0xe0] sm:$0xf]  ;;  %v1757_v42 = vld [vmem:[#allocation10 + $0xc4] sm:$0xf0] }
  0x55   :  { %686 = vmatpush.bf16.msrb.mxu3 %v1387_v43  ;;  %663 = vmatpush.bf16.msrb.mxu1 %v1423_v59  ;;  %v1742_v59 = vld [vmem:[#allocation10 + $0x54] sm:$0xf]  ;;  %v1576_v33 = vld [vmem:[#allocation10 + $0xd8] sm:$0xf0]  ;;  %v1566_v41 = vld [vmem:[#allocation10 + $0xc0] sm:$0xf] }
  0x56   :  { %v1536_v11 = vld [vmem:[#allocation10 + $0x88] sm:$0xf0] }
  0x57   :  { %676 = vmatpush.bf16.msrb.mxu2 %v1299_v25  ;;  %v1411_v25 = vor.u32 %v1716_v22, %v1408_v24  ;;  %v1587_v22 = vor.u32 %v1760_v20, %v1584_v21  ;;  %v1737_v24 = vld [vmem:[#allocation10 + $0x24] sm:$0xf0] }
  0x58   :  { %651 = vmatpush.bf16.msrb.mxu0 %v1351_v26  ;;  %v1526_v26 = vld [vmem:[#allocation10 + $0x70] sm:$0xf] }
  0x59   :  { %687 = vmatpush.bf16.msrb.mxu3 %v1379_v55  ;;  %664 = vmatpush.bf16.msrb.mxu1 %v1415_v4  ;;  %v1527_v28 = vor.u32 %v1747_v27, %v1526_v26  ;;  %v1488_v27 = vld [vmem:[#allocation10 + $0x28] sm:$0xf0] }
  0x5b   :  { %677 = vmatpush.bf16.msrb.mxu2 %v1291_v39 }
  0x5c   :  { %652 = vmatpush.bf16.msrb.mxu0 %v1343_v31  ;;  %v157_v31 = vld [vmem:[#allocation7] sm:$0x7] }
  0x5d   :  { %688 = vmatpush.bf16.msrb.mxu3 %v1371_v63  ;;  %665 = vmatpush.bf16.msrb.mxu1 %v1407_v13  ;;  %v160_v36 = vperm.slane %v157_v31, 1  ;;  %v161_v54 = vperm.slane %v157_v31, 2  ;;  %v1515_v63 = vor.u32 %v1742_v59, %v1512_v60  ;;  %v1738_v13 = vld [vmem:[#allocation10 + $0x34] sm:$0xf]  ;;  %v1550_v59 = vld [vmem:[#allocation10 + $0xa0] sm:$0xf] }
  0x5e   :  { %v1499_v18 = vor.u32 %v1738_v13, %v1496_v15  ;;  %v1753_v60 = vld [vmem:[#allocation10 + $0xa4] sm:$0xf0]  ;;  %v1779_v13 = vld [vmem:[#allocation11 + $0x78] sm:$0xff]  ;;  %v386_v15 = vld [vmem:[%s2083_s4] sm:$0x3] }
  0x5f   :  { %678 = vmatpush.bf16.msrb.mxu2 %v1283_v51  ;;  %v1520_v51 = vld [vmem:[#allocation10 + $0x68] sm:$0xf0] }
  0x60   :  { %697 = vmatpush.bf16.msra.mxu0 %v1467_v32  ;;  %v1519_v32 = vor.u32 %v1745_v30, %v1518_v29  ;;  %v1574_v29 = vld [vmem:[#allocation10 + $0xd0] sm:$0xf]  ;;  %v1759_v30 = vld [vmem:[#allocation10 + $0xd4] sm:$0xf0] }
  0x61   :  { %689 = vmatpush.bf16.msrb.mxu3 %v1363_v8  ;;  %912 = vmatpush.bf16.msra.mxu1 %v1527_v28  ;;  %v1591_v8 = vor.u32 %v1763_v6, %v1590_v5  ;;  %v1544_v5 = vld [vmem:[#allocation10 + $0x98] sm:$0xf0] }
  0x63   :  { %925 = vmatpush.bf16.msra.mxu2 %v1591_v8  ;;  %v1749_v8 = vld [vmem:[#allocation10 + $0x84] sm:$0xf0] }
  0x64   :  { %698 = vmatpush.bf16.msra.mxu0 %v1459_v35  ;;  %v159_v35 = vperm.slane %v157_v31, 0  ;;  %v1575_v31 = vor.u32 %v1759_v30, %v1574_v29 }
  0x65   :  { %690 = vmatpush.bf16.msrb.mxu3 %v1355_v17  ;;  %913 = vmatpush.bf16.msra.mxu1 %v1519_v32  ;;  %v1761_v17 = vld [vmem:[#allocation10 + $0xe4] sm:$0xf0]  ;;  %v1758_v32 = vld [vmem:[#allocation10 + $0xd4] sm:$0xf] }
  0x66   :  { %v1579_v34 = vor.u32 %v1758_v32, %v1576_v33 }
  0x68   :  { %699 = vmatpush.bf16.msra.mxu0 %v1451_v44  ;;  %v1502_v44 = vld [vmem:[#allocation10 + $0x40] sm:$0xf] }
  0x69   :  { %691 = vmatpush.bf16.msrb.mxu3 %v1347_v23  ;;  %914 = vmatpush.bf16.msra.mxu1 %v1511_v37  ;;  %v1503_v52 = vor.u32 %v1741_v45, %v1502_v44  ;;  %v1486_v23 = vld [vmem:[#allocation10 + $0x20] sm:$0xf]  ;;  %v1734_v37 = vld [vmem:[#allocation10 + $0x14] sm:$0xf]  ;;  %v1567_v44 = vor.u32 %v1757_v42, %v1566_v41  ;;  %v1568_v45 = vld [vmem:[#allocation10 + $0xc8] sm:$0xf0] }
  0x6a   :  { %v1487_v26 = vor.u32 %v1737_v24, %v1486_v23  ;;  %v1770_v42 = vld [vmem:[#allocation11 + $0x30] sm:$0xff] }
  0x6c   :  { %700 = vmatpush.bf16.msra.mxu0 %v1443_v56  ;;  %v1523_v56 = vor.u32 %v1744_v50, %v1520_v51  ;;  %v1472_v51 = vld [vmem:[#allocation10 + $0x8] sm:$0xf0] }
  0x6d   :  { %915 = vmatpush.bf16.msra.mxu1 %v1503_v52 }
  0x70   :  { %701 = vmatpush.bf16.msra.mxu0 %v1435_v1  ;;  %v1504_v1 = vld [vmem:[#allocation10 + $0x48] sm:$0xf0] }
  0x71   :  { %v1507_v3 = vor.u32 %v1740_v0, %v1504_v1  ;;  %916 = vmatpush.bf16.msra.mxu1 %v1495_v14  ;;  %v1542_v1 = vld [vmem:[#allocation10 + $0x90] sm:$0xf]  ;;  %v1771_v14 = vld [vmem:[#allocation11 + $0x38] sm:$0xff] }
  0x74   :  { %702 = vmatpush.bf16.msra.mxu0 %v1427_v10  ;;  %v1595_v10 = vor.u32 %v1762_v7, %v1592_v9  ;;  %v1534_v7 = vld [vmem:[#allocation10 + $0x80] sm:$0xf]  ;;  %v1748_v9 = vld [vmem:[#allocation10 + $0x84] sm:$0xf] }
  0x75   :  { %917 = vmatpush.bf16.msra.mxu1 %v1487_v26  ;;  %v1539_v12 = vor.u32 %v1748_v9, %v1536_v11  ;;  %v1793_v9 = vld [vmem:[%s2087_s8] ss:$0 sm:$0xff]  ;;  %s1990_s8 = smov [#allocation13]  }
  0x76   :  { %s1165_s22 = sshll.u32 %s1990_s8, 4  ;;  %s1166_s22 = int_to_ptr.vmem [resolvable:$true] %s1165_s22 }
  0x78   :  { %703 = vmatpush.bf16.msra.mxu0 %v1419_v19  ;;  %v1583_v19 = vor.u32 %v1761_v17, %v1582_v16  ;;  %v1778_v17 = vld [vmem:[#allocation11 + $0x70] sm:$0xff] }
  0x7a   :  { %926 = vmatpush.bf16.msra.mxu2 %v1583_v19  ;;  %v1777_v19 = vld [vmem:[#allocation11 + $0x68] sm:$0xff] }
  0x7c   :  { %704 = vmatpush.bf16.msra.mxu0 %v1411_v25  ;;  %v1736_v25 = vld [vmem:[#allocation10 + $0x24] sm:$0xf] }
  0x7d   :  { %v1491_v28 = vor.u32 %v1736_v25, %v1488_v27 }
  0x7e   :  { %927 = vmatpush.bf16.msra.mxu2 %v1575_v31  ;;  %v389_v31 = vperm.slane %v386_v15, 1 }
  0x82   :  { %928 = vmatpush.bf16.msra.mxu2 %v1567_v44  ;;  %v1769_v44 = vld [vmem:[#allocation11 + $0x28] sm:$0xff] }
  0xbc   :  { %v302_v38 = vpop.f32.mrf.mxu0 }
  0xbd   :  { %v303_v39 = vadd.f32 %v302_v38, %v159_v35  ;;  %v315_v40 = vpop.f32.mrf.mxu1  ;;  %v1478_v35 = vld [vmem:[#allocation10 + $0x10] sm:$0xf] }
  0xbe   :  { %v316_v43 = vadd.f32 %v315_v40, %v160_v36  ;;  %v1735_v36 = vld [vmem:[#allocation10 + $0x14] sm:$0xf0] }
  0xbf   :  { %v332_v46 = vmax.f32 %v303_v39, 0.0  ;;  %v1479_v38 = vor.u32 %v1735_v36, %v1478_v35  ;;  %v1480_v39 = vld [vmem:[#allocation10 + $0x18] sm:$0xf0] }
  0xc0   :  { %v333_v47 = vmax.f32 %v316_v43, 0.0  ;;  %v1483_v40 = vor.u32 %v1734_v37, %v1480_v39  ;;  %v1756_v43 = vld [vmem:[#allocation10 + $0xc4] sm:$0xf] }
  0xc1   :  { %v335_v49 = vpack.c.bf16 %v332_v46, %v332_v46  ;;  %918 = vmatpush.bf16.msra.mxu1 %v1479_v38  ;;  %v1571_v46 = vor.u32 %v1756_v43, %v1568_v45  ;;  %v1776_v43 = vld [vmem:[#allocation11 + $0x60] sm:$0xff]  ;;  %v1775_v45 = vld [vmem:[#allocation11 + $0x58] sm:$0xff] }
  0xc2   :  { %v336_v53 = vpack.c.bf16 %v333_v47, %v333_v47  ;;  %v1470_v47 = vld [vmem:[#allocation10] sm:$0xf] }
  0xc3   :  { %640 = vmatmul.bf16.vlgmr.msra.gmra.mxu3 %v335_v49  ;;  %679 = vmatmul.bf16.vlgmr.msrb.gmra.mxu2 %v335_v49  ;;  %v1732_v49 = vld [vmem:[#allocation10 + $0x4] sm:$0xf] }
  0xc4   :  { %653 = vmatmul.bf16.vlgmr.msrb.gmra.mxu0 %v336_v53  ;;  %v304_v55 = vpop.f32.mrf.mxu0  ;;  %938 = vmatpush.bf16.msra.mxu3 %v1531_v48  ;;  %v1733_v48 = vld [vmem:[#allocation10 + $0x4] sm:$0xf0]  ;;  %v1475_v52 = vor.u32 %v1732_v49, %v1472_v51  ;;  %v1772_v51 = vld [vmem:[#allocation11 + $0x40] sm:$0xff] }
  0xc5   :  { %v317_v57 = vpop.f32.mrf.mxu1  ;;  %v328_v58 = vpop.f32.mrf.mxu2  ;;  %951 = vmatpush.bf16.msrb.mxu0 %v1595_v10  ;;  %v1471_v50 = vor.u32 %v1733_v48, %v1470_v47  ;;  %v1754_v55 = vld [vmem:[#allocation10 + $0xb4] sm:$0xf]  ;;  %v1535_v10 = vor.u32 %v1749_v8, %v1534_v7  ;;  %v1767_v48 = vld [vmem:[#allocation11 + $0x18] sm:$0xff]  ;;  %v1773_v49 = vld [vmem:[#allocation11 + $0x48] sm:$0xff] }
  0xc6   :  { %v329_v61 = vadd.f32 %v328_v58, %v161_v54  ;;  %v1755_v54 = vld [vmem:[#allocation10 + $0xb4] sm:$0xf0]  ;;  %v1560_v57 = vld [vmem:[#allocation10 + $0xb8] sm:$0xf0]  ;;  %v1774_v47 = vld [vmem:[#allocation11 + $0x50] sm:$0xff] }
  0xc7   :  { %919 = vmatpush.bf16.msra.mxu1 %v1471_v50  ;;  %v1563_v58 = vor.u32 %v1754_v55, %v1560_v57  ;;  %v1766_v50 = vld [vmem:[#allocation11 + $0x10] sm:$0xff] }
  0xc8   :  { %v334_v62 = vmax.f32 %v329_v61, 0.0  ;;  %939 = vmatpush.bf16.msra.mxu3 %v1523_v56  ;;  %v1752_v61 = vld [vmem:[#allocation10 + $0xa4] sm:$0xf] }
  0xc9   :  { %952 = vmatpush.bf16.msrb.mxu0 %v1587_v22 }
  0xca   :  { %v337_v2 = vpack.c.bf16 %v334_v62, %v334_v62  ;;  %v1551_v62 = vor.u32 %v1753_v60, %v1550_v59 }
  0xcc   :  { %666 = vmatmul.bf16.vlgmr.msrb.gmra.mxu1 %v337_v2  ;;  %940 = vmatpush.bf16.msra.mxu3 %v1515_v63  ;;  %v1552_v63 = vld [vmem:[#allocation10 + $0xa8] sm:$0xf0] }
  0xcd   :  { %v330_v4 = vpop.f32.mrf.mxu2  ;;  %953 = vmatpush.bf16.msrb.mxu0 %v1579_v34  ;;  %v1555_v0 = vor.u32 %v1752_v61, %v1552_v63  ;;  %1100 = vmatpush.bf16.msrb.mxu1 %v1771_v14 }
  0xd0   :  { %941 = vmatpush.bf16.msra.mxu3 %v1507_v3  ;;  %v1750_v3 = vld [vmem:[#allocation10 + $0x94] sm:$0xf] }
  0xd1   :  { %954 = vmatpush.bf16.msrb.mxu0 %v1571_v46  ;;  %v1547_v6 = vor.u32 %v1750_v3, %v1544_v5  ;;  %1101 = vmatpush.bf16.msrb.mxu1 %v1770_v42  ;;  %v1768_v46 = vld [vmem:[#allocation11 + $0x20] sm:$0xff] }
  0xd3   :  { %692 = vmatmul.bf16.vlgmr.msrb.gmra.mxu3 %v336_v53  ;;  %v1558_v53 = vld [vmem:[#allocation10 + $0xb0] sm:$0xf] }
  0xd4   :  { %705 = vmatmul.bf16.vlgmr.msra.gmra.mxu0 %v337_v2  ;;  %942 = vmatpush.bf16.msra.mxu3 %v1499_v18  ;;  %v1559_v56 = vor.u32 %v1755_v54, %v1558_v53  ;;  %v1751_v2 = vld [vmem:[#allocation10 + $0x94] sm:$0xf0]  ;;  %v388_v18 = vperm.slane %v386_v15, 0  ;;  %v1764_v53 = vld [vmem:[#allocation11] sm:$0xff] }
  0xd5   :  { %955 = vmatpush.bf16.msrb.mxu0 %v1563_v58  ;;  %v1543_v4 = vor.u32 %v1751_v2, %v1542_v1  ;;  %1102 = vmatpush.bf16.msrb.mxu1 %v1769_v44 }
  0xd6   :  { %929 = vmatpush.bf16.msra.mxu2 %v1559_v56  ;;  %v746_v56 = vld [vmem:[%s2085_s6] sm:$0x3] }
  0xd7   :  { %v749_v58 = vperm.slane %v746_v56, 1 }
  0xd8   :  { %943 = vmatpush.bf16.msra.mxu3 %v1491_v28 }
  0xd9   :  { %956 = vmatpush.bf16.msrb.mxu0 %v1555_v0  ;;  %1103 = vmatpush.bf16.msrb.mxu1 %v1768_v46 }
  0xda   :  { %930 = vmatpush.bf16.msra.mxu2 %v1551_v62  ;;  %v748_v62 = vperm.slane %v746_v56, 0 }
  0xdc   :  { %944 = vmatpush.bf16.msra.mxu3 %v1483_v40 }
  0xdd   :  { %957 = vmatpush.bf16.msrb.mxu0 %v1547_v6  ;;  %1104 = vmatpush.bf16.msrb.mxu1 %v1767_v48 }
  0xde   :  { %931 = vmatpush.bf16.msra.mxu2 %v1543_v4 }
  0xe0   :  { %945 = vmatpush.bf16.msra.mxu3 %v1475_v52  ;;  %v1765_v52 = vld [vmem:[#allocation11 + $0x8] sm:$0xff] }
  0xe1   :  { %958 = vmatpush.bf16.msrb.mxu0 %v1539_v12  ;;  %1105 = vmatpush.bf16.msrb.mxu1 %v1766_v50 }
  0xe2   :  { %932 = vmatpush.bf16.msra.mxu2 %v1535_v10 }
  0xe5   :  { %1106 = vmatpush.bf16.msrb.mxu1 %v1765_v52 }
  0xe6   :  { %1113 = vmatpush.bf16.msrb.mxu2 %v1779_v13  ;;  %v1126_v13 = vlaneseq }
  0xe9   :  { %1107 = vmatpush.bf16.msrb.mxu1 %v1764_v53 }
  0xea   :  { %1114 = vmatpush.bf16.msrb.mxu2 %v1778_v17 }
  0xee   :  { %1115 = vmatpush.bf16.msrb.mxu2 %v1777_v19 }
  0xf2   :  { %1116 = vmatpush.bf16.msrb.mxu2 %v1776_v43 }
  0xf6   :  { %1117 = vmatpush.bf16.msrb.mxu2 %v1775_v45 }
  0xfa   :  { %1118 = vmatpush.bf16.msrb.mxu2 %v1774_v47 }
  0xfe   :  { %1119 = vmatpush.bf16.msrb.mxu2 %v1773_v49 }
 0x102   :  { %1120 = vmatpush.bf16.msrb.mxu2 %v1772_v51 }
 0x141   :  { %v654_v16 = vpop.f32.mrf.mxu0 }
 0x146   :  { %v641_v20 = vpop.f32.mrf.mxu3  ;;  %v680_v21 = vpop.f32.mrf.mxu2 }
 0x147   :  { %v642_v22 = vadd.f32 %v641_v20, %v388_v18  ;;  %v681_v34 = vadd.f32 %v680_v21, %v389_v31 }
 0x149   :  { %v656_v23 = vpop.f32.mrf.mxu0  ;;  %v655_v24 = vadd.f32 %v654_v16, %v642_v22  ;;  %v667_v25 = vpop.f32.mrf.mxu1  ;;  %v1127_v16 = vand.u32 127, %v1126_v13 }
 0x14b   :  { %v668_v26 = vadd.f32 %v667_v25, %v655_v24  ;;  %vm1136_vm0 = vcmp.lt.s32.totalorder %v1127_v16, 5  ;;  %vm1128_vm3 = vcmp.eq.s32.totalorder %v1127_v16, 5 }
 0x14d   :  { %v710_v27 = vmax.f32 %v668_v26, 0.0 }
 0x14e   :  { %v643_v28 = vpop.f32.mrf.mxu3  ;;  %v682_v29 = vpop.f32.mrf.mxu2 }
 0x14f   :  { %v712_v30 = vpack.c.bf16 %v710_v27, %v710_v27 }
 0x151   :  { %v706_v32 = vpop.f32.mrf.mxu0  ;;  %920 = vmatmul.bf16.vlgmr.msra.gmra.mxu1 %v712_v30  ;;  %946 = vmatmul.bf16.vlgmr.msra.gmra.mxu3 %v712_v30  ;;  %v669_v33 = vpop.f32.mrf.mxu1 }
 0x156   :  { %v693_v35 = vpop.f32.mrf.mxu3 }
 0x157   :  { %v694_v36 = vadd.f32 %v693_v35, %v681_v34 }
 0x159   :  { %v707_v37 = vadd.f32 %v706_v32, %v694_v36  ;;  %v708_v38 = vpop.f32.mrf.mxu0 }
 0x15b   :  { %v711_v39 = vmax.f32 %v707_v37, 0.0 }
 0x15d   :  { %v713_v40 = vpack.c.bf16 %v711_v39, %v711_v39 }
 0x15e   :  { %v695_v41 = vpop.f32.mrf.mxu3 }
 0x15f   :  { %933 = vmatmul.bf16.vlgmr.msra.gmra.mxu2 %v713_v40  ;;  %959 = vmatmul.bf16.vlgmr.msrb.gmra.mxu0 %v713_v40 }
 0x1ce   :  { %v921_v54 = vpop.f32.mrf.mxu1 }
 0x1cf   :  { %v922_v1 = vadd.f32 %v921_v54, %v748_v62 }
 0x1d4   :  { %v947_v55 = vpop.f32.mrf.mxu3 }
 0x1d5   :  { %v948_v59 = vadd.f32 %v947_v55, %v749_v58 }
 0x1d6   :  { %v923_v57 = vpop.f32.mrf.mxu1 }
 0x1dc   :  { %v949_v60 = vpop.f32.mrf.mxu3  ;;  %v960_v61 = vpop.f32.mrf.mxu0 }
 0x1dd   :  { %v961_v63 = vadd.f32 %v960_v61, %v948_v59 }
 0x1df   :  { %v965_v0 = vmax.f32 %v961_v63, 0.0 }
 0x1e1   :  { %v967_v2 = vpack.c.bf16 %v965_v0, %v965_v0 }
 0x1e2   :  { %v934_v3 = vpop.f32.mrf.mxu2 }
 0x1e3   :  { %v935_v4 = vadd.f32 %v934_v3, %v922_v1  ;;  %1121 = vmatmul.bf16.vlgmr.msrb.gmra.mxu2 %v967_v2 }
 0x1e4   :  { %v962_v5 = vpop.f32.mrf.mxu0 }
 0x1e5   :  { %v964_v6 = vmax.f32 %v935_v4, 0.0 }
 0x1e7   :  { %v966_v7 = vpack.c.bf16 %v964_v6, %v964_v6 }
 0x1e9   :  { %1108 = vmatmul.bf16.vlgmr.msrb.gmra.mxu1 %v966_v7 }
 0x1ea   :  { %v936_v8 = vpop.f32.mrf.mxu2 }
 0x266   :  { %v1109_v10 = vpop.f32.mrf.mxu1  ;;  %v1122_v11 = vpop.f32.mrf.mxu2 }
 0x267   :  { %v1110_v12 = vadd.f32 %v1793_v9, %v1109_v10 }
 0x269   :  { %v1123_v14 = vadd.f32 %v1122_v11, %v1110_v12 }
 0x26b   :  { %1794 = vtanh.f32 %v1123_v14  ;;  %v1130_v15 = vmul.f32 0.5, %v1123_v14 }
 0x26d   :  { %1796 = vtanh.f32 %v1130_v15 }
 0x26e   :  { %v1111_v17 = vpop.f32.mrf.mxu1  ;;  %v1124_v18 = vpop.f32.mrf.mxu2 }
 0x271   :  { %v1795_v19 = vpop.eup %1794 }
 0x272   :  { %vm1135_vm1 = vcmp.gt.f32.partialorder %v1795_v19, 0.0 }
 0x273   :  { %v1797_v20 = vpop.eup %1796  ;;  %vm2068_vm2 = vmand %vm1135_vm1, %vm1136_vm0 }
 0x274   :  { %v1132_v22 = vadd.f32 1.0, %v1797_v20  ;;  %v1138_v23 = vsel %vm2068_vm2, %v1795_v19, 0.0 }
 0x275   :  { %1139 = vadd.xlane.f32.xlu0 %v1138_v23 }
 0x276   :  { %v1133_v24 = vmul.f32 0.5, %v1132_v22 }
 0x278   :  { %v1134_v25 = vsel %vm1128_vm3, %v1133_v24, %v1795_v19 }
 0x2e8   :  { %v1140_v26 = vpop.xlane.xlu0 %1139 }
 0x2e9   :  { %vm1141_vm4 = vcmp.gt.f32.partialorder %v1140_v26, 0.0 }
 0x2ea   :  { %v1142_v27 = vsel %vm1141_vm4, %v1140_v26, 1.0 }
 0x2eb   :  { %1798 = vrcp.f32 %v1142_v27  ;;  %v1154_v31 = vand.u32 2147483648, %v1142_v27  ;;  %v1152_v33 = vand.u32 2147483647, %v1142_v27  ;;  %vm1148_vm6 = vweird.f32 %v1142_v27 }
 0x2ed   :  { %v1155_v35 = vor.u32 1.1754944e-38, %v1154_v31  ;;  %vm1153_vm8 = vcmp.eq.f32.partialorder %v1152_v33, 8.507059e+37 }
 0x2f1   :  { %v1799_v28 = vpop.eup %1798 }
 0x2f2   :  { %v1144_v29 = vmul.f32 %v1799_v28, %v1142_v27  ;;  %vm1149_vm5 = vweird.f32 %v1799_v28 }
 0x2f3   :  { %vm1150_vm7 = vmor %vm1148_vm6, %vm1149_vm5 }
 0x2f4   :  { %v1145_v30 = vsub.f32 1.0, %v1144_v29 }
 0x2f6   :  { %v1146_v32 = vmul.f32 %v1799_v28, %v1145_v30 }
 0x2f8   :  { %v1147_v34 = vadd.f32 %v1799_v28, %v1146_v32 }
 0x2fa   :  { %v1151_v36 = vsel %vm1150_vm7, %v1799_v28, %v1147_v34 }
 0x2fb   :  { %v1156_v37 = vsel %vm1153_vm8, %v1155_v35, %v1151_v36 }
 0x2fc   :  { %v1157_v38 = vmul.f32 %v1795_v19, %v1156_v37 }
 0x2fe   :  { %v1158_v39 = vsel %vm2068_vm2, %v1157_v38, %v1134_v25 }
 0x2ff   :  { %1159 = vst [vmem:[#allocation13] sm:$0xff] %v1158_v39 }
 0x300   :  { %1170 = dma.vmem_to_hbm [thread:$0]  %s1166_s22, 128, %s1168_s24, [#allocation4]  }
 0x301   :  { %1976 = dma.done.wait [#allocation4], 128  }
 0x302   :  { %1977 = vsyncadd [#allocation4], 4294967168 }
 0x303   :  { %1175 = vsyncpa [#allocation3], 1 }
 0x304   :  { %1176 = vsyncpa [#allocation6], 1 }
 0x305   :  { %1177 = vsyncpa [#allocation9], 1 }
 0x306   :  { %1178 = vsyncpa [#allocation12], 1 }
 0x307   :  { %1179 = vsyncpa [#allocation4], 1 }

</bundles_post_ra>
